<compile_context>
chip_gen: v7x
topology: tpu7x:2x2x1
jax: 0.10.0
libtpu: 0.0.40
codegen_flags: <defaults>
</compile_context>

<pallas_src>
import math
from functools import partial

import jax
import jax.numpy as jnp
from jax.experimental import pallas as pl
from jax.experimental.pallas import tpu as pltpu

LANE = 128                       # TPU lane width (vreg last dim)
_VMEM_LIMIT = 32 * 1024 * 1024   # safe on v5e/v6e (128 MiB) and v7x (64 MiB) alike


def _round_up(n, m):
    return ((n + m - 1) // m) * m


# ----------------------------- Pallas kernel -----------------------------

def make_mlp_kernel(num_hidden):
    """Fused MLP: num_hidden x (Linear + ReLU) followed by a final Linear.

    Ref layout (all VMEM; only x / out are batch-tiled over the grid):
      x_ref : (TB, F_in)                                  f32
      per layer (interleaved): w_ref (F_in_i, F_out_i), b_ref (1, F_out_i)
      o_ref : (TB, F_out_padded)   f32, lane-dense (multiple of 128)
    """
    def kernel(x_ref, *refs):
        o_ref = refs[-1]
        h = x_ref[...]
        # Hidden layers: one MXU matmul + bias + ReLU each, all in registers / VMEM.
        for i in range(num_hidden):
            w = refs[2 * i][...]
            b = refs[2 * i + 1][...]
            h = jnp.dot(h.astype(w.dtype), w, preferred_element_type=jnp.float32)
            h = jnp.maximum(h + b.astype(jnp.float32), 0.0)
        # Output layer (no ReLU), written to a lane-dense (128-multiple) slab.
        w = refs[2 * num_hidden][...]
        b = refs[2 * num_hidden + 1][...]
        out = jnp.dot(h.astype(w.dtype), w, preferred_element_type=jnp.float32)
        o_ref[...] = (out + b.astype(jnp.float32)).astype(o_ref.dtype)
    return kernel


# ----------------------------- wrapper -----------------------------

def blind_model_forward(x, weights, *, tile_b=None):
    """x: (B, in_features) f32.  weights: {'hidden': [(w, b), ...], 'out': (w, b)}.

    Weights are stored pre-transposed as (in, out); biases as (out,).
    Weights may be f32 or bf16 (bf16 halves weight DMA; accumulation stays f32).
    Handles arbitrary (non-multiple) batch sizes by zero-padding the batch.
    """
    B, F_in = x.shape
    hidden = list(weights["hidden"])
    w_out, b_out = weights["out"]
    num_hidden = len(hidden)
    out_features = w_out.shape[1]

    # ---- Lane-dense output: pad final layer N dim up to a multiple of 128 ----
    out_padded = _round_up(out_features, LANE)
    if out_padded != out_features:
        w_out = jnp.pad(w_out, ((0, 0), (0, out_padded - out_features)))
        b_out = jnp.pad(b_out, ((0, out_padded - out_features),))

    # ---- Batch tiling: one big step for small batches, 256-row tiles otherwise ----
    if tile_b is None:
        tile_b = B if B <= 256 else 256
    B_pad = _round_up(B, tile_b)
    x_in = jnp.pad(x, ((0, B_pad - B), (0, 0))) if B_pad != B else x
    num_steps = B_pad // tile_b

    # Flatten params (weights as-is, biases reshaped to (1, n) 2-D VMEM tiles).
    flat_params = []
    for (w, b) in hidden + [(w_out, b_out)]:
        flat_params.append(w)
        flat_params.append(b.reshape(1, -1))

    # BlockSpecs: x / out tiled over the batch grid axis; weights are full-array
    # blocks whose block index never changes (re-used every step; with the default
    # single-step grid for small B no multi-buffering is generated at all).
    in_specs = [pl.BlockSpec((tile_b, F_in), lambda i: (i, 0))]
    for arr in flat_params:
        in_specs.append(
            pl.BlockSpec(arr.shape, lambda i, _nd=arr.ndim: (0,) * _nd))
    out_spec = pl.BlockSpec((tile_b, out_padded), lambda i: (i, 0))

    # Advisory cost estimate so XLA schedules sensibly around this tiny call.
    dims = [F_in] + [w.shape[1] for (w, _) in hidden] + [out_padded]
    flops = 2 * B_pad * sum(dims[i] * dims[i + 1] for i in range(len(dims) - 1))
    bytes_accessed = (x_in.size * x_in.dtype.itemsize
                      + sum(a.size * a.dtype.itemsize for a in flat_params)
                      + B_pad * out_padded * 4)

    out = pl.pallas_call(
        make_mlp_kernel(num_hidden),
        out_shape=jax.ShapeDtypeStruct((B_pad, out_padded), jnp.float32),
        grid=(num_steps,),
        in_specs=in_specs,
        out_specs=out_spec,
        compiler_params=pltpu.CompilerParams(
            # Only shard across TCs when there are >= 2 real steps; a single small
            # step runs on one core (no duplicated weight DMA / sync).
            dimension_semantics=("parallel",) if num_steps > 1 else ("arbitrary",),
            vmem_limit_bytes=_VMEM_LIMIT,
        ),
        cost_estimate=pl.CostEstimate(
            flops=flops, transcendentals=0, bytes_accessed=bytes_accessed),
    )(x_in, *flat_params)

    # Strip batch / lane padding.
    return out[:B, :out_features]


# ----------------------------- init (PyTorch-style) -----------------------------

def init_weights(key, in_features, hidden_layer_size, hidden_layer_num,
                 out_features, dtype=jnp.float32):
    """PyTorch nn.Linear default init: U(-1/sqrt(fan_in), 1/sqrt(fan_in)).

    Weights are stored pre-transposed as (fan_in, fan_out) so the kernel computes
    x @ W (equivalent to PyTorch's x @ W_pt.T).
    """
    hidden = []
    fan_in = in_features
    for _ in range(hidden_layer_num):
        key, kw, kb = jax.random.split(key, 3)
        bound = 1.0 / math.sqrt(fan_in)
        w = jax.random.uniform(kw, (fan_in, hidden_layer_size), jnp.float32,
                               -bound, bound).astype(dtype)
        b = jax.random.uniform(kb, (hidden_layer_size,), jnp.float32,
                               -bound, bound).astype(dtype)
        hidden.append((w, b))
        fan_in = hidden_layer_size
    key, kw, kb = jax.random.split(key, 3)
    bound = 1.0 / math.sqrt(hidden_layer_size)
    w_out = jax.random.uniform(kw, (hidden_layer_size, out_features),
                               jnp.float32, -bound, bound).astype(dtype)
    b_out = jax.random.uniform(kb, (out_features,), jnp.float32,
                               -bound, bound).astype(dtype)
    return {"hidden": hidden, "out": (w_out, b_out)}


# ----------------------------- reference (pure JAX, same numerics) -----------------------------

def blind_model_ref(x, weights):
    h = x
    for (w, b) in weights["hidden"]:
        h = jnp.dot(h.astype(w.dtype), w, preferred_element_type=jnp.float32)
        h = jnp.maximum(h + b.astype(jnp.float32), 0.0)
    w, b = weights["out"]
    return (jnp.dot(h.astype(w.dtype), w, preferred_element_type=jnp.float32)
            + b.astype(jnp.float32))


# ----------------------------- main -----------------------------

if __name__ == "__main__":
    fwd = jax.jit(blind_model_forward)

    # Case 1: shapes implied by the module (DDQN-sized):
    #   batch=16, in_features=32, hidden_layer_size=128, hidden_layer_num=2, out=16.
    #   -> single grid step (grid=(1,)), lane-padded 128-wide output slab.
    B, IN_F, HID, NUM_HID, OUT_F = 16, 32, 128, 2, 16
    key = jax.random.PRNGKey(0)
    kx, kw, kx2, kw2 = jax.random.split(key, 4)

    x = jax.random.normal(kx, (B, IN_F), dtype=jnp.float32)
    weights = init_weights(kw, IN_F, HID, NUM_HID, OUT_F)
    out = jax.block_until_ready(fwd(x, weights))
    assert out.shape == (B, OUT_F) and out.dtype == jnp.float32
    ref = jax.block_until_ready(blind_model_ref(x, weights))
    assert jnp.allclose(out, ref, atol=1e-5, rtol=1e-5), float(
        jnp.max(jnp.abs(out - ref)))

    # Case 2: non-multiple batch exercising the tiled (multi-step, parallel) path
    # with batch padding + slicing.
    B2, NUM_HID2 = 300, 3
    x2 = jax.random.normal(kx2, (B2, IN_F), dtype=jnp.float32)
    weights2 = init_weights(kw2, IN_F, HID, NUM_HID2, OUT_F)
    out2 = jax.block_until_ready(fwd(x2, weights2))
    ref2 = jax.block_until_ready(blind_model_ref(x2, weights2))
    assert out2.shape == (B2, OUT_F)
    assert jnp.allclose(out2, ref2, atol=1e-5, rtol=1e-5), float(
        jnp.max(jnp.abs(out2 - ref2)))

    # Case 3: bf16 weights (v6e/v7x MXU-friendly), f32 accumulation / bias / ReLU.
    weights_bf16 = init_weights(kw, IN_F, HID, NUM_HID, OUT_F, dtype=jnp.bfloat16)
    out3 = jax.block_until_ready(fwd(x, weights_bf16))
    ref3 = jax.block_until_ready(blind_model_ref(x, weights_bf16))
    assert out3.dtype == jnp.float32
    assert jnp.allclose(out3, ref3, atol=1e-2, rtol=1e-2), float(
        jnp.max(jnp.abs(out3 - ref3)))

    print("KERNEL_OK")
</pallas_src>

<mosaic_0001>
module attributes {stable_mosaic.version = 11 : i64} {
  func.func @kernel(%arg0: i32, %arg1: memref<16x32xf32, #tpu.memory_space<vmem>>, %arg2: memref<32x128xf32, #tpu.memory_space<vmem>>, %arg3: memref<1x128xf32, #tpu.memory_space<vmem>>, %arg4: memref<128x128xf32, #tpu.memory_space<vmem>>, %arg5: memref<1x128xf32, #tpu.memory_space<vmem>>, %arg6: memref<128x128xf32, #tpu.memory_space<vmem>>, %arg7: memref<1x128xf32, #tpu.memory_space<vmem>>, %arg8: memref<16x128xf32, #tpu.memory_space<vmem>>) attributes {dimension_semantics = [#tpu.dimension_semantics<arbitrary>], iteration_bounds = array<i64: 1>, scalar_prefetch = 0 : i64, scratch_operands = 0 : i64, tpu.core_type = #tpu.core_type<tc>, window_params = [{transform_indices = @transform_0, window_bounds = array<i64: 16, 32>}, {pipeline_mode = #tpu.pipeline_mode<synchronous>, transform_indices = @transform_1, window_bounds = array<i64: 32, 128>}, {pipeline_mode = #tpu.pipeline_mode<synchronous>, transform_indices = @transform_2, window_bounds = array<i64: 1, 128>}, {pipeline_mode = #tpu.pipeline_mode<synchronous>, transform_indices = @transform_3, window_bounds = array<i64: 128, 128>}, {pipeline_mode = #tpu.pipeline_mode<synchronous>, transform_indices = @transform_4, window_bounds = array<i64: 1, 128>}, {pipeline_mode = #tpu.pipeline_mode<synchronous>, transform_indices = @transform_5, window_bounds = array<i64: 128, 128>}, {pipeline_mode = #tpu.pipeline_mode<synchronous>, transform_indices = @transform_6, window_bounds = array<i64: 1, 128>}, {transform_indices = @transform_7, window_bounds = array<i64: 16, 128>}]} {
    %c0 = arith.constant 0 : index
    %c0_0 = arith.constant 0 : index
    %0 = vector.load %arg1[%c0, %c0_0] : memref<16x32xf32, #tpu.memory_space<vmem>>, vector<16x32xf32>
    %c0_1 = arith.constant 0 : index
    %c0_2 = arith.constant 0 : index
    %1 = vector.load %arg2[%c0_1, %c0_2] : memref<32x128xf32, #tpu.memory_space<vmem>>, vector<32x128xf32>
    %c0_3 = arith.constant 0 : index
    %c0_4 = arith.constant 0 : index
    %2 = vector.load %arg3[%c0_3, %c0_4] : memref<1x128xf32, #tpu.memory_space<vmem>>, vector<1x128xf32>
    %cst = arith.constant dense<0.000000e+00> : vector<16x128xf32>
    %3 = tpu.matmul %0, %1, %cst {dimension_numbers = #tpu.dot_dimension_numbers<[1], [0], [0], [1], [0, 0, 1, 1], [], []>} : vector<16x32xf32>, vector<32x128xf32>, vector<16x128xf32> -> vector<16x128xf32>
    %4 = vector.broadcast %2 : vector<1x128xf32> to vector<16x128xf32>
    %5 = arith.addf %3, %4 : vector<16x128xf32>
    %cst_5 = arith.constant 0.000000e+00 : f32
    %6 = vector.broadcast %cst_5 : f32 to vector<16x128xf32>
    %7 = arith.maximumf %5, %6 : vector<16x128xf32>
    %c0_6 = arith.constant 0 : index
    %c0_7 = arith.constant 0 : index
    %8 = vector.load %arg4[%c0_6, %c0_7] : memref<128x128xf32, #tpu.memory_space<vmem>>, vector<128x128xf32>
    %c0_8 = arith.constant 0 : index
    %c0_9 = arith.constant 0 : index
    %9 = vector.load %arg5[%c0_8, %c0_9] : memref<1x128xf32, #tpu.memory_space<vmem>>, vector<1x128xf32>
    %cst_10 = arith.constant dense<0.000000e+00> : vector<16x128xf32>
    %10 = tpu.matmul %7, %8, %cst_10 {dimension_numbers = #tpu.dot_dimension_numbers<[1], [0], [0], [1], [0, 0, 1, 1], [], []>} : vector<16x128xf32>, vector<128x128xf32>, vector<16x128xf32> -> vector<16x128xf32>
    %11 = vector.broadcast %9 : vector<1x128xf32> to vector<16x128xf32>
    %12 = arith.addf %10, %11 : vector<16x128xf32>
    %cst_11 = arith.constant 0.000000e+00 : f32
    %13 = vector.broadcast %cst_11 : f32 to vector<16x128xf32>
    %14 = arith.maximumf %12, %13 : vector<16x128xf32>
    %c0_12 = arith.constant 0 : index
    %c0_13 = arith.constant 0 : index
    %15 = vector.load %arg6[%c0_12, %c0_13] : memref<128x128xf32, #tpu.memory_space<vmem>>, vector<128x128xf32>
    %c0_14 = arith.constant 0 : index
    %c0_15 = arith.constant 0 : index
    %16 = vector.load %arg7[%c0_14, %c0_15] : memref<1x128xf32, #tpu.memory_space<vmem>>, vector<1x128xf32>
    %cst_16 = arith.constant dense<0.000000e+00> : vector<16x128xf32>
    %17 = tpu.matmul %14, %15, %cst_16 {dimension_numbers = #tpu.dot_dimension_numbers<[1], [0], [0], [1], [0, 0, 1, 1], [], []>} : vector<16x128xf32>, vector<128x128xf32>, vector<16x128xf32> -> vector<16x128xf32>
    %18 = vector.broadcast %16 : vector<1x128xf32> to vector<16x128xf32>
    %19 = arith.addf %17, %18 : vector<16x128xf32>
    %c0_17 = arith.constant 0 : index
    %c0_18 = arith.constant 0 : index
    %20 = vector.load %arg8[%c0_17, %c0_18] : memref<16x128xf32, #tpu.memory_space<vmem>>, vector<16x128xf32>
    tpu.vector_store %arg8[%c0_17, %c0_18], %19 {strides = array<i32>} : memref<16x128xf32, #tpu.memory_space<vmem>>, vector<16x128xf32>,
    return
  }
  func.func @transform_0(%arg0: i32) -> (i32, i32) {
    %c0_i32 = arith.constant 0 : i32
    %c0_i32_0 = arith.constant 0 : i32
    return %arg0, %c0_i32 : i32, i32
  }
  func.func @transform_1(%arg0: i32) -> (i32, i32) {
    %c0_i32 = arith.constant 0 : i32
    %c0_i32_0 = arith.constant 0 : i32
    %c0_i32_1 = arith.constant 0 : i32
    return %c0_i32, %c0_i32_0 : i32, i32
  }
  func.func @transform_2(%arg0: i32) -> (i32, i32) {
    %c0_i32 = arith.constant 0 : i32
    %c0_i32_0 = arith.constant 0 : i32
    %c0_i32_1 = arith.constant 0 : i32
    return %c0_i32, %c0_i32_0 : i32, i32
  }
  func.func @transform_3(%arg0: i32) -> (i32, i32) {
    %c0_i32 = arith.constant 0 : i32
    %c0_i32_0 = arith.constant 0 : i32
    %c0_i32_1 = arith.constant 0 : i32
    return %c0_i32, %c0_i32_0 : i32, i32
  }
  func.func @transform_4(%arg0: i32) -> (i32, i32) {
    %c0_i32 = arith.constant 0 : i32
    %c0_i32_0 = arith.constant 0 : i32
    %c0_i32_1 = arith.constant 0 : i32
    return %c0_i32, %c0_i32_0 : i32, i32
  }
  func.func @transform_5(%arg0: i32) -> (i32, i32) {
    %c0_i32 = arith.constant 0 : i32
    %c0_i32_0 = arith.constant 0 : i32
    %c0_i32_1 = arith.constant 0 : i32
    return %c0_i32, %c0_i32_0 : i32, i32
  }
  func.func @transform_6(%arg0: i32) -> (i32, i32) {
    %c0_i32 = arith.constant 0 : i32
    %c0_i32_0 = arith.constant 0 : i32
    %c0_i32_1 = arith.constant 0 : i32
    return %c0_i32, %c0_i32_0 : i32, i32
  }
  func.func @transform_7(%arg0: i32) -> (i32, i32) {
    %c0_i32 = arith.constant 0 : i32
    %c0_i32_0 = arith.constant 0 : i32
    return %arg0, %c0_i32 : i32, i32
  }
}

</mosaic_0001>

<bundles_post_ra>
// kernel: blind_model_forward.1
= control target key start
LH: loop header
LB: loop body
LE: loop exit
PB: predicated region body
PF: predicated region fallthrough
CT: control target
= control target key end

     0   :  { %vm40_vm0 = vcmask 261120   ;;  %s747_s0 = inlined_call_operand.vmem [shape: f32[16,32], index: 0, kind: input, shape index: {}]   ;;  %s748_s1 = inlined_call_operand.vmem [shape: f32[32,128], index: 1, kind: input, shape index: {}]   ;;  %s749_s2 = inlined_call_operand.vmem [shape: f32[1,128], index: 2, kind: input, shape index: {}]   ;;  %s750_s3 = inlined_call_operand.vmem [shape: f32[128,128], index: 3, kind: input, shape index: {}]   ;;  %s751_s4 = inlined_call_operand.vmem [shape: f32[1,128], index: 4, kind: input, shape index: {}]   ;;  %s752_s5 = inlined_call_operand.vmem [shape: f32[128,128], index: 5, kind: input, shape index: {}]   ;;  %s753_s6 = inlined_call_operand.vmem [shape: f32[1,128], index: 6, kind: input, shape index: {}]   ;;  %s754_s7 = inlined_call_operand.hbm [shape: f32[16,128], index: 7, kind: output, shape index: {}]  }
   0x1   :  { %v29_v0 = vld [vmem:[%s748_s1] sm:$0xff]  ;;  %v30_v1 = vld [vmem:[%s748_s1 + $0x8] sm:$0xff]  ;;  %v31_v2 = vld [vmem:[%s748_s1 + $0x10] sm:$0xff] }
   0x2   :  { %v468_v3 = vpack.c.bf16 %v30_v1, %v29_v0  ;;  %v32_v4 = vld [vmem:[%s748_s1 + $0x18] sm:$0xff]  ;;  %v27_v5 = vld [vmem:[%s747_s0] sm:$0xff]  ;;  %v125_v8 = vld [vmem:[%s750_s3 + $0x8] sm:$0xff] }
   0x3   :  { %v472_v6 = vpack.c.bf16 %v32_v4, %v31_v2  ;;  %395 = vmatprep.mubr.msk.f32.mxu0 %vm40_vm0, %v27_v5  ;;  %v124_v7 = vld [vmem:[%s750_s3] sm:$0xff]  ;;  %v126_v9 = vld [vmem:[%s750_s3 + $0x10] sm:$0xff]  ;;  %v127_v11 = vld [vmem:[%s750_s3 + $0x18] sm:$0xff] }
   0x4   :  { %469 = vmatprep.subr.bf16.mxu0 %v468_v3  ;;  %v476_v10 = vpack.c.bf16 %v125_v8, %v124_v7  ;;  %v480_v12 = vpack.c.bf16 %v127_v11, %v126_v9  ;;  %v128_v13 = vld [vmem:[%s750_s3 + $0x20] sm:$0xff]  ;;  %v129_v14 = vld [vmem:[%s750_s3 + $0x28] sm:$0xff] }
   0x5   :  { %471 = vmatpush3.bf16.msra.mxu0 %v468_v3 }
   0x6   :  { %473 = vmatprep.subr.bf16.mxu0 %v472_v6  ;;  %477 = vmatprep.subr.bf16.mxu1 %v476_v10 }
   0x7   :  { %479 = vmatpush3.bf16.msra.mxu1 %v476_v10 }
   0x8   :  { %12 = vsyncpa [#allocation3], 0  ;;  %481 = vmatprep.subr.bf16.mxu1 %v480_v12  ;;  %v484_v15 = vpack.c.bf16 %v129_v14, %v128_v13  ;;  %v28_v16 = vld [vmem:[%s747_s0 + $0x8] sm:$0xff]  ;;  %v130_v17 = vld [vmem:[%s750_s3 + $0x30] sm:$0xff] }
   0x9   :  { %475 = vmatpush3.bf16.msra.mxu0 %v472_v6  ;;  %v131_v18 = vld [vmem:[%s750_s3 + $0x38] sm:$0xff]  ;;  %v132_v20 = vld [vmem:[%s750_s3 + $0x40] sm:$0xff]  ;;  %v133_v21 = vld [vmem:[%s750_s3 + $0x48] sm:$0xff] }
   0xa   :  { %v488_v19 = vpack.c.bf16 %v131_v18, %v130_v17  ;;  %v492_v22 = vpack.c.bf16 %v133_v21, %v132_v20  ;;  %v134_v23 = vld [vmem:[%s750_s3 + $0x50] sm:$0xff]  ;;  %v135_v24 = vld [vmem:[%s750_s3 + $0x58] sm:$0xff]  ;;  %v136_v26 = vld [vmem:[%s750_s3 + $0x60] sm:$0xff] }
   0xb   :  { %483 = vmatpush3.bf16.msra.mxu1 %v480_v12  ;;  %v496_v25 = vpack.c.bf16 %v135_v24, %v134_v23  ;;  %v137_v27 = vld [vmem:[%s750_s3 + $0x68] sm:$0xff]  ;;  %v138_v29 = vld [vmem:[%s750_s3 + $0x70] sm:$0xff]  ;;  %v139_v30 = vld [vmem:[%s750_s3 + $0x78] sm:$0xff] }
   0xc   :  { %396 = vmatmul.mubr.msk.f32.vlgmr.msra.gmra.mrb[0].mxu0 %vm40_vm0, %v28_v16  ;;  %485 = vmatprep.subr.bf16.mxu1 %v484_v15  ;;  %v500_v28 = vpack.c.bf16 %v137_v27, %v136_v26  ;;  %v504_v31 = vpack.c.bf16 %v139_v30, %v138_v29  ;;  %v224_v32 = vld [vmem:[%s752_s5] sm:$0xff]  ;;  %v225_v33 = vld [vmem:[%s752_s5 + $0x8] sm:$0xff]  ;;  %v226_v34 = vld [vmem:[%s752_s5 + $0x10] sm:$0xff] }
   0xd   :  { %v508_v35 = vpack.c.bf16 %v225_v33, %v224_v32  ;;  %v227_v36 = vld [vmem:[%s752_s5 + $0x18] sm:$0xff]  ;;  %v228_v38 = vld [vmem:[%s752_s5 + $0x20] sm:$0xff]  ;;  %v229_v39 = vld [vmem:[%s752_s5 + $0x28] sm:$0xff] }
   0xe   :  { %v512_v37 = vpack.c.bf16 %v227_v36, %v226_v34  ;;  %v516_v40 = vpack.c.bf16 %v229_v39, %v228_v38  ;;  %v230_v41 = vld [vmem:[%s752_s5 + $0x30] sm:$0xff]  ;;  %v231_v42 = vld [vmem:[%s752_s5 + $0x38] sm:$0xff]  ;;  %v232_v44 = vld [vmem:[%s752_s5 + $0x40] sm:$0xff] }
   0xf   :  { %487 = vmatpush3.bf16.msra.mxu1 %v484_v15  ;;  %509 = vmatprep.subr.bf16.mxu0 %v508_v35  ;;  %v520_v43 = vpack.c.bf16 %v231_v42, %v230_v41  ;;  %v233_v45 = vld [vmem:[%s752_s5 + $0x48] sm:$0xff]  ;;  %v234_v47 = vld [vmem:[%s752_s5 + $0x50] sm:$0xff]  ;;  %v235_v48 = vld [vmem:[%s752_s5 + $0x58] sm:$0xff] }
  0x10   :  { %489 = vmatprep.subr.bf16.mxu1 %v488_v19  ;;  %511 = vmatpush3.bf16.msra.mxu0 %v508_v35  ;;  %v524_v46 = vpack.c.bf16 %v233_v45, %v232_v44  ;;  %v528_v49 = vpack.c.bf16 %v235_v48, %v234_v47  ;;  %v236_v50 = vld [vmem:[%s752_s5 + $0x60] sm:$0xff]  ;;  %v237_v51 = vld [vmem:[%s752_s5 + $0x68] sm:$0xff]  ;;  %v238_v60 = vld [vmem:[%s752_s5 + $0x70] sm:$0xff] }
  0x11   :  { %513 = vmatprep.subr.bf16.mxu0 %v512_v37  ;;  %v532_v52 = vpack.c.bf16 %v237_v51, %v236_v50  ;;  %v340_v53 = vld [vmem:[%s749_s2] ss:$0 sm:$0xff]  ;;  %v239_v61 = vld [vmem:[%s752_s5 + $0x78] sm:$0xff]  ;;  %s567_s5 = smov [#allocation2]  }
  0x12   :  { %v536_v62 = vpack.c.bf16 %v239_v61, %v238_v60  ;;  %v343_v63 = vld [vmem:[%s751_s4] ss:$0 sm:$0xff]  ;;  %s329_s29 = sshll.u32 %s567_s5, 4  ;;  %s330_s29 = int_to_ptr.vmem [resolvable:$true] %s329_s29 }
  0x13   :  { %491 = vmatpush3.bf16.msra.mxu1 %v488_v19  ;;  %v344_v6 = vld [vmem:[%s753_s6] ss:$0 sm:$0xff]  ;;  %s543_s4 = scalar_lea.vmem %s330_s29, 256  ;;  %p548_p1 = scmp.lt.s32.totalorder %s330_s29, %s330_s29 }
  0x14   :  { %493 = vmatprep.subr.bf16.mxu1 %v492_v22  ;;  %515 = vmatpush3.bf16.msra.mxu0 %v512_v37  ;;  %p544_p0 = scmp.ne.s32.totalorder %s330_s29, %s543_s4  ;;  %p549_p2 = scmp.lt.s32.totalorder %s543_s4, %s543_s4 }
  0x15   :  { %517 = vmatprep.subr.bf16.mxu0 %v516_v40 }
  0x16   :  { %p550_p3 = por %p549_p2, %p548_p1 }
  0x17   :  { %495 = vmatpush3.bf16.msra.mxu1 %v492_v22 }
  0x18   :  { %497 = vmatprep.subr.bf16.mxu1 %v496_v25  ;;  %519 = vmatpush3.bf16.msra.mxu0 %v516_v40  ;;  %p551_p4 = pnand %p550_p3, %p544_p0 }
  0x19   :  { %521 = vmatprep.subr.bf16.mxu0 %v520_v43 }
  0x1b   :  { %499 = vmatpush3.bf16.msra.mxu1 %v496_v25 }
  0x1c   :  { %501 = vmatprep.subr.bf16.mxu1 %v500_v28  ;;  %523 = vmatpush3.bf16.msra.mxu0 %v520_v43 }
  0x1d   :  { %525 = vmatprep.subr.bf16.mxu0 %v524_v46 }
  0x1f   :  { %503 = vmatpush3.bf16.msra.mxu1 %v500_v28 }
  0x20   :  { %505 = vmatprep.subr.bf16.mxu1 %v504_v31  ;;  %527 = vmatpush3.bf16.msra.mxu0 %v524_v46 }
  0x21   :  { %529 = vmatprep.subr.bf16.mxu0 %v528_v49 }
  0x23   :  { %507 = vmatpush3.bf16.msra.mxu1 %v504_v31 }
  0x24   :  { %531 = vmatpush3.bf16.msra.mxu0 %v528_v49 }
  0x25   :  { %533 = vmatprep.subr.bf16.mxu0 %v532_v52 }
  0x28   :  { %535 = vmatpush3.bf16.msra.mxu0 %v532_v52 }
  0x29   :  { %537 = vmatprep.subr.bf16.mxu0 %v536_v62 }
  0x2c   :  { %539 = vmatpush3.bf16.msra.mxu0 %v536_v62 }
  0xdf   :  { %v397_v54 = vpop.f32.mrb[0].mxu0 }
  0xe0   :  { %v119_v55 = vadd.f32 %v397_v54, %v340_v53  ;;  %v113_v56 = vpop.f32.mrb[1].mxu0 }
  0xe1   :  { %v114_v57 = vadd.f32 %v340_v53, %v113_v56 }
  0xe2   :  { %v123_v59 = vmax.f32 %v119_v55, 0.0 }
  0xe3   :  { %v122_v58 = vmax.f32 %v114_v57, 0.0 }
  0xe5   :  { %430 = vmatprep.mubr.f32.mxu1 %v122_v58 }
  0xe6   :  { %431 = vmatmul.mubr.f32.vlgmr.msra.gmra.mrb[0].mxu1 %v123_v59 }
 0x1b9   :  { %v432_v0 = vpop.f32.mrb[0].mxu1 }
 0x1ba   :  { %v219_v1 = vadd.f32 %v432_v0, %v343_v63  ;;  %v213_v2 = vpop.f32.mrb[1].mxu1 }
 0x1bb   :  { %v214_v3 = vadd.f32 %v343_v63, %v213_v2 }
 0x1bc   :  { %v223_v5 = vmax.f32 %v219_v1, 0.0 }
 0x1bd   :  { %v222_v4 = vmax.f32 %v214_v3, 0.0 }
 0x1bf   :  { %465 = vmatprep.mubr.f32.mxu0 %v222_v4 }
 0x1c0   :  { %466 = vmatmul.mubr.f32.vlgmr.msra.gmra.mrb[2].mxu0 %v223_v5 }
 0x293   :  { %v467_v7 = vpop.f32.mrb[2].mxu0 }
 0x294   :  { %v319_v8 = vadd.f32 %v467_v7, %v344_v6  ;;  %v313_v9 = vpop.f32.mrb[3].mxu0 }
 0x295   :  { %v314_v10 = vadd.f32 %v344_v6, %v313_v9 }
 0x296   :  { %323 = vst [vmem:[#allocation2 + $0x8] sm:$0xff] %v319_v8 }
 0x297   :  { %322 = vst [vmem:[#allocation2] sm:$0xff] %v314_v10 }
 0x298   :  { %554 = shalt.err (!%p551_p4)
}
 0x299   :  { %s555_s6 = scalar_lea.hbm %s754_s7, 256 }
 0x29a   :  { %p556_p5 = scmp.ne.s32.totalorder %s754_s7, %s555_s6  ;;  %p559_p6 = scmp.lt.u32.totalorder %s555_s6, %s754_s7 }
 0x29c   :  { %p561_p7 = pnand %p559_p6, %p556_p5 }
 0x29e   :  { %564 = shalt.err (!%p561_p7)
}
 0x29f   :  { %s568_s12 = smov 128   ;;  %s569_s13 = smov 8  }
 0x2a0   :  { %335 = dma.vmem_to_hbm [thread:$0]  %s330_s29, 256, %s754_s7, [#allocation3], %s568_s12, %s568_s12, %s569_s13  }
 0x2a1   :  { %565 = dma.done.wait [#allocation3], 256  }
 0x2a2   :  { %566 = vsyncadd [#allocation3], 4294967040 }
 0x2a3   :  { %339 = vsyncpa [#allocation3], 1 }

</bundles_post_ra>
